<compile_context>
chip_gen: v7x
topology: tpu7x:2x2x1
jax: 0.10.0
libtpu: 0.0.40
codegen_flags: <defaults>
</compile_context>

<pallas_src>
import functools
from typing import NamedTuple

import jax
import jax.numpy as jnp
from jax.experimental import pallas as pl
from jax.experimental.pallas import tpu as pltpu


def _round_up(a, b):
    return (a + b - 1) // b * b


# --------------------------------------------------------------------------
# Kernels
# --------------------------------------------------------------------------
def _fp_kernel_single(x_ref, a_ref, o_ref):
    # Single-shot: full-KN contraction in one grid step; output written once.
    # x_ref: (bm, KNp), a_ref: (KNp, tn), o_ref: (bm, tn)
    o_ref[...] = jnp.dot(
        x_ref[...], a_ref[...], preferred_element_type=jnp.float32
    ).astype(o_ref.dtype)


def _fp_kernel_f32_acc(x_ref, a_ref, o_ref):
    # k-axis variant, f32 output: accumulate directly into the resident
    # output tile (no scratch, no final copy).
    @pl.when(pl.program_id(2) == 0)
    def _():
        o_ref[...] = jnp.zeros_like(o_ref)

    o_ref[...] += jnp.dot(
        x_ref[...], a_ref[...], preferred_element_type=jnp.float32
    )


def _fp_kernel_lowprec_out(x_ref, a_ref, o_ref, acc_ref):
    # k-axis variant for non-f32 outputs: f32 accumulator scratch + final cast.
    @pl.when(pl.program_id(2) == 0)
    def _():
        acc_ref[...] = jnp.zeros_like(acc_ref)

    acc_ref[...] += jnp.dot(
        x_ref[...], a_ref[...], preferred_element_type=jnp.float32
    )

    @pl.when(pl.program_id(2) == pl.num_programs(2) - 1)
    def _():
        o_ref[...] = acc_ref[...].astype(o_ref.dtype)


# --------------------------------------------------------------------------
# Tile planning (generation aware)
# --------------------------------------------------------------------------
class _Plan(NamedTuple):
    bm: int
    tn: int
    tk: int
    BCp: int
    Mp: int
    KNp: int
    collapse_k: bool
    a_nbuf: int
    vmem_limit: int


def _plan(BC, M, KN, compute_dtype, out_dtype):
    itemsize = jnp.dtype(compute_dtype).itemsize
    out_itemsize = jnp.dtype(out_dtype).itemsize
    sub = 16 if itemsize == 2 else 8  # packed sublane tile for bf16

    # Generation-aware VMEM budget for the pipelined working set.
    try:
        vmem_cap = int(pltpu.get_tpu_info().vmem_capacity_bytes)
    except Exception:
        vmem_cap = 64 << 20  # conservative fallback (v7x-sized)
    small_vmem = vmem_cap <= (64 << 20)            # v7x: 64 MiB per TensorCore
    budget = (40 << 20) if small_vmem else (64 << 20)

    # bm: rows of x per tile. Bigger bm => A re-streamed from HBM fewer times.
    bm_cap = 512 if small_vmem else 1024
    bm = min(_round_up(BC, sub), bm_cap)
    BCp = _round_up(BC, bm)

    # tn: lane-dense output tile; force >=2 blocks on the parallel M axis when
    # possible (v7x megacore: each TensorCore streams half of A).
    Mr = _round_up(M, 128)
    tn = min(1024, Mr)
    if Mr >= 256:
        tn = min(tn, _round_up(Mr // 2, 128))
    Mp = _round_up(M, tn)

    # Deeper A pipelining considered when per-tile compute is tiny.
    a_nbuf_budget = 3 if bm <= 128 else 2

    KNr = _round_up(KN, 128)
    needs_acc = jnp.dtype(out_dtype) != jnp.dtype(jnp.float32)

    def footprint(tk, with_acc):
        return (2 * bm * tk * itemsize                 # x tile (double buffered)
                + a_nbuf_budget * tk * tn * itemsize   # A tile
                + 2 * bm * tn * out_itemsize           # output tile
                + (bm * tn * 4 if with_acc else 0))    # f32 accumulator scratch

    # Collapse the reduction axis entirely when the full KN fits the budget:
    # no k grid axis, no init pl.when, output written exactly once.
    if footprint(KNr, with_acc=False) <= budget:
        collapse_k = True
        tk = KNr
        KNp = KNr
        fp = footprint(tk, with_acc=False)
    else:
        collapse_k = False
        tk = 128
        for cand in (4096, 3072, 2048, 1536, 1024, 768, 512, 384, 256, 128):
            if cand <= KNr and footprint(cand, needs_acc) <= budget:
                tk = cand
                break
        KNp = _round_up(KN, tk)
        fp = footprint(tk, needs_acc)

    if collapse_k:
        steps = (BCp // bm) * (Mp // tn)
    else:
        steps = (BCp // bm) * (Mp // tn) * (KNp // tk)
    # Only pay for a third A buffer when there are enough grid steps for the
    # deeper prefetch to matter.
    a_nbuf = a_nbuf_budget if steps >= 4 else 2

    vmem_limit = int(min(max(fp + (8 << 20), 32 << 20), vmem_cap))
    return _Plan(bm, tn, tk, BCp, Mp, KNp, collapse_k, a_nbuf, vmem_limit)


# --------------------------------------------------------------------------
# One-time preparation of the static projection matrix
# --------------------------------------------------------------------------
def _prepare_At(A, KNp, Mp, compute_dtype):
    """Transpose A once to (KN, M), cast to the compute dtype and zero-pad to
    tile multiples.  Done once per projector, outside the per-call hot path."""
    M, KN = A.shape
    At = jnp.asarray(A).T.astype(compute_dtype)
    if (KNp, Mp) != (KN, M):
        At = jnp.pad(At, ((0, KNp - KN), (0, Mp - M)))
    return At


def _a_block_spec(block_shape, index_map, n_buf):
    # Deeper pipelining on the A stream when requested; falls back to the
    # default double-buffered BlockSpec if unsupported.
    if n_buf > 2 and hasattr(pl, "Buffered"):
        try:
            return pl.BlockSpec(block_shape, index_map,
                                pipeline_mode=pl.Buffered(n_buf))
        except TypeError:
            pass
    return pl.BlockSpec(block_shape, index_map)


def _build_call(plan, out_dtype, compute_dtype):
    bm, tn, tk = plan.bm, plan.tn, plan.tk
    BCp, Mp, KNp = plan.BCp, plan.Mp, plan.KNp
    itemsize = jnp.dtype(compute_dtype).itemsize

    cost = pl.CostEstimate(
        flops=2 * BCp * KNp * Mp,
        transcendentals=0,
        bytes_accessed=((Mp // tn) * BCp * KNp * itemsize      # x re-read per j
                        + (BCp // bm) * KNp * Mp * itemsize    # A re-read per i
                        + BCp * Mp * jnp.dtype(out_dtype).itemsize),
    )
    out_shape = jax.ShapeDtypeStruct((BCp, Mp), out_dtype)

    if plan.collapse_k:
        grid = (BCp // bm, Mp // tn)
        in_specs = [
            pl.BlockSpec((bm, KNp), lambda i, j: (i, 0)),              # x2d tile
            _a_block_spec((KNp, tn), lambda i, j: (0, j), plan.a_nbuf),  # At tile
        ]
        out_specs = pl.BlockSpec((bm, tn), lambda i, j: (i, j))
        kernel = _fp_kernel_single
        scratch = []
        semantics = ("parallel", "parallel")
    else:
        grid = (BCp // bm, Mp // tn, KNp // tk)
        in_specs = [
            pl.BlockSpec((bm, tk), lambda i, j, k: (i, k)),               # x2d tile
            _a_block_spec((tk, tn), lambda i, j, k: (k, j), plan.a_nbuf),  # At tile
        ]
        out_specs = pl.BlockSpec((bm, tn), lambda i, j, k: (i, j))
        if jnp.dtype(out_dtype) == jnp.dtype(jnp.float32):
            kernel = _fp_kernel_f32_acc
            scratch = []
        else:
            kernel = _fp_kernel_lowprec_out
            scratch = [pltpu.VMEM((bm, tn), jnp.float32)]
        semantics = ("parallel", "parallel", "arbitrary")

    return pl.pallas_call(
        kernel,
        out_shape=out_shape,
        grid_spec=pltpu.PrefetchScalarGridSpec(
            num_scalar_prefetch=0,
            grid=grid,
            in_specs=in_specs,
            out_specs=out_specs,
            scratch_shapes=scratch,
        ),
        compiler_params=pltpu.CompilerParams(
            dimension_semantics=semantics,
            vmem_limit_bytes=plan.vmem_limit,
        ),
        cost_estimate=cost,
    )


def _apply(x, At, *, plan, call, gammaN, M, compute_dtype):
    # Per-call hot path: only x is reshaped/padded/cast; A was prepared once.
    B, C, N, K = x.shape
    BC = B * C
    KN = K * N
    x2d = x.reshape(BC, KN).astype(compute_dtype)   # torch's x.reshape(B*C, K*N)
    if (plan.BCp, plan.KNp) != (BC, KN):
        x2d = jnp.pad(x2d, ((0, plan.BCp - BC), (0, plan.KNp - KN)))
    out2d = call(x2d, At)                           # (BCp, Mp)
    out2d = out2d[:BC, :M]
    # == proj2D.transpose(1, 0).reshape(B, C, gammaN, -1)
    return out2d.reshape(B, C, gammaN, -1)


# --------------------------------------------------------------------------
# Public API
# --------------------------------------------------------------------------
class FPProjector:
    """Pallas TPU forward-projection operator (dense analogue of FPLayer).

    Holds the projection matrix A of shape (M, K*N) with M = gammaN * n_det
    and maps (B, C, N, K) image batches to (B, C, gammaN, n_det).  All
    per-call-invariant work on A (transpose, pad, bf16 cast) and the compiled
    pallas_call are prepared once per (B*C, out dtype) and cached.
    """

    def __init__(self, A, gammaN, *, compute_dtype=jnp.bfloat16):
        self.A = jnp.asarray(A)
        self.M, self.KN = self.A.shape
        self.gammaN = int(gammaN)
        assert self.M % self.gammaN == 0
        self.compute_dtype = jnp.dtype(compute_dtype)
        self._cache = {}

    def _get(self, BC, out_dtype):
        key = (BC, jnp.dtype(out_dtype).name)
        entry = self._cache.get(key)
        if entry is None:
            plan = _plan(BC, self.M, self.KN, self.compute_dtype, out_dtype)
            At = _prepare_At(self.A, plan.KNp, plan.Mp, self.compute_dtype)
            At = jax.block_until_ready(At)  # materialize once, off the hot path
            call = _build_call(plan, out_dtype, self.compute_dtype)
            fn = jax.jit(functools.partial(
                _apply, plan=plan, call=call, gammaN=self.gammaN, M=self.M,
                compute_dtype=self.compute_dtype))
            entry = (fn, At)
            self._cache[key] = entry
        return entry

    def __call__(self, x):
        B, C, N, K = x.shape
        assert K * N == self.KN, "A must have K*N columns"
        fn, At = self._get(B * C, x.dtype)
        return fn(x, At)


def fp_forward(x, A, gammaN, *, compute_dtype=jnp.bfloat16):
    """One-off convenience wrapper.  For repeated calls, construct an
    FPProjector once and reuse it so A preparation stays off the hot path."""
    return FPProjector(A, gammaN, compute_dtype=compute_dtype)(x)


if __name__ == "__main__":
    # Small deterministic problem consistent with the module.
    B, C, N, K = 2, 4, 16, 16          # input image batch (BC = 8)
    gammaN, n_det = 16, 32             # projection angles x detector bins
    M = gammaN * n_det                 # rows of A = 512 (>= 2 parallel M blocks)
    KN = K * N                         # columns of A = 256

    key = jax.random.PRNGKey(0)
    kx, ka = jax.random.split(key)
    x = jax.random.normal(kx, (B, C, N, K), dtype=jnp.float32)
    # Deterministic synthetic (dense) projection matrix A (M, K*N).
    # TODO(synk): original layer loads a sparse COO A from A_matrix.npz; the
    # sparse SpMM is densified here (no clean Pallas sparse path).
    A = jax.random.normal(ka, (M, KN), dtype=jnp.float32) * 0.1

    fp = FPProjector(A, gammaN)
    out = jax.block_until_ready(fp(x))       # first call: builds + runs
    out2 = jax.block_until_ready(fp(x))      # second call: cached hot path

    # Reference in plain JAX f32 (same math as the torch.sparse.mm path).
    # Tolerance relaxed because the kernel matmul runs in bf16 with f32 acc.
    x2d = x.reshape(B * C, KN)
    ref = (A @ x2d.T).T.reshape(B, C, gammaN, -1)
    assert out.shape == (B, C, gammaN, n_det)
    assert jnp.allclose(out, ref, atol=5e-2, rtol=5e-2), float(
        jnp.max(jnp.abs(out - ref))
    )
    assert jnp.array_equal(out, out2)

    print("KERNEL_OK")
</pallas_src>

<mosaic_0001>
module attributes {stable_mosaic.version = 11 : i64} {
  func.func @_fp_kernel_single(%arg0: i32, %arg1: i32, %arg2: memref<16x256xbf16, #tpu.memory_space<vmem>>, %arg3: memref<256x256xbf16, #tpu.memory_space<vmem>>, %arg4: memref<16x256xf32, #tpu.memory_space<vmem>>) attributes {dimension_semantics = [#tpu.dimension_semantics<parallel>, #tpu.dimension_semantics<parallel>], iteration_bounds = array<i64: 1, 2>, scalar_prefetch = 0 : i64, scratch_operands = 0 : i64, tpu.core_type = #tpu.core_type<tc>, window_params = [{transform_indices = @transform_0, window_bounds = array<i64: 16, 256>}, {transform_indices = @transform_1, window_bounds = array<i64: 256, 256>}, {transform_indices = @transform_2, window_bounds = array<i64: 16, 256>}]} {
    %c0 = arith.constant 0 : index
    %c0_0 = arith.constant 0 : index
    %0 = vector.load %arg2[%c0, %c0_0] : memref<16x256xbf16, #tpu.memory_space<vmem>>, vector<16x256xbf16>
    %c0_1 = arith.constant 0 : index
    %c0_2 = arith.constant 0 : index
    %1 = vector.load %arg3[%c0_1, %c0_2] : memref<256x256xbf16, #tpu.memory_space<vmem>>, vector<256x256xbf16>
    %cst = arith.constant dense<0.000000e+00> : vector<16x256xf32>
    %2 = tpu.matmul %0, %1, %cst {dimension_numbers = #tpu.dot_dimension_numbers<[1], [0], [0], [1], [0, 0, 1, 1], [], []>} : vector<16x256xbf16>, vector<256x256xbf16>, vector<16x256xf32> -> vector<16x256xf32>
    %c0_3 = arith.constant 0 : index
    %c0_4 = arith.constant 0 : index
    %3 = vector.load %arg4[%c0_3, %c0_4] : memref<16x256xf32, #tpu.memory_space<vmem>>, vector<16x256xf32>
    tpu.vector_store %arg4[%c0_3, %c0_4], %2 {strides = array<i32>} : memref<16x256xf32, #tpu.memory_space<vmem>>, vector<16x256xf32>,
    return
  }
  func.func @transform_0(%arg0: i32, %arg1: i32) -> (i32, i32) {
    %c0_i32 = arith.constant 0 : i32
    %c0_i32_0 = arith.constant 0 : i32
    return %arg0, %c0_i32 : i32, i32
  }
  func.func @transform_1(%arg0: i32, %arg1: i32) -> (i32, i32) {
    %c0_i32 = arith.constant 0 : i32
    %c0_i32_0 = arith.constant 0 : i32
    return %c0_i32, %arg1 : i32, i32
  }
  func.func @transform_2(%arg0: i32, %arg1: i32) -> (i32, i32) {
    %c0_i32 = arith.constant 0 : i32
    return %arg0, %arg1 : i32, i32
  }
}

</mosaic_0001>

<bundles_post_ra>
// kernel: _apply.1
= control target key start
LH: loop header
LB: loop body
LE: loop exit
PB: predicated region body
PF: predicated region fallthrough
CT: control target
= control target key end

     0   :  { %7 = vsyncpa [#allocation3], 0  ;;  %s1013_s0 = inlined_call_operand.vmem [shape: bf16[16,256], index: 0, kind: input, shape index: {}]   ;;  %s1014_s1 = inlined_call_operand.hbm [shape: bf16[256,512], index: 1, kind: input, shape index: {}]   ;;  %s1015_s2 = inlined_call_operand.vmem [shape: f32[16,512], index: 2, kind: output, shape index: {}]  }
   0x1   :  { %9 = vsyncpa [#allocation3 + $0x1], 0  ;;  %s837_s9 = smov 0   ;;  %s839_s10 = smov 0  }
   0x2   :  { %s841_s11 = smov 0   ;;  %s843_s12 = smov 0  }
   0x3   :  { %s845_s13 = smov 0   ;;  %s847_s14 = smov 0  }
   0x4 LB: > { %s575_s15 = sadd.s32 4294967295, %s816_s14   ;;  %s24_s16 = sadd.s32 1, %s812_s13  ;;  %s816_s14 = sphi %s847_s14, %s15_s14   ;;  %s812_s13 = sphi %s845_s13, %s1026_s13   ;;  %s808_s12 = sphi %s843_s12, %s1025_s12   ;;  %s804_s11 = sphi %s841_s11, %s1024_s11   ;;  %s800_s10 = sphi %s839_s10, %s1023_s10   ;;  %s796_s9 = sphi %s837_s9, %s1022_s9  }
   0x5   : > { %p25_p0 = scmp.ge.s32.totalorder %s24_s16, 2  ;;  %s60_s17 = sadd.s32 1, %s804_s11 }
   0x6   : > { %p67_p1 = scmp.ne.s32.totalorder %s804_s11, %s800_s10  ;;  %p68_p2 = scmp.eq.s32.totalorder %s816_s14, 0 }
   0x7   : > { %s1028_s16 = smov (%p25_p0, %s24_s16), 0  ;;  %p73_p4 = scmp.ne.s32.totalorder %s800_s10, %s796_s9 }
   0x8   : > { %p873_p3 = por %p68_p2, %p67_p1  ;;  %s57_s19 = ssub.s32 %s812_s13, %s1028_s16 }
   0x9   : > { %p74_p5 = scmp.eq.s32.totalorder %s575_s15, 0  ;;  %p58_p6 = scmp.eq.s32.totalorder %s57_s19, 0 }
   0xa   : > { %p99_p7 = scmp.eq.s32.totalorder %s575_s15, 1  ;;  %p633_p10 = scmp.lt.s32.totalorder %s816_s14, 2 }
   0xb   : > { %p880_p8 = por %p74_p5, %p73_p4  ;;  %s135_s23 = sand.u32 1, %s804_s11  }
   0xc   : > { %s885_s21 = scalar_select %p58_p6, %s804_s11, %s60_s17  }
   0xd   : > { %p887_p9 = por %p99_p7, %p67_p1  ;;  %s625_s24 = sshll.u32 %s812_s13, 7 }
   0xe   : > { %s580_s25 = sshll.u32 %s135_s23, 8  ;;  %s897_s28 = scalar_lea.hbm %s1014_s1, %s625_s24 }
   0xf   : > { %s1018_s22 = scalar_select %p887_p9, 1, 0 }
  0x10   : > { %s139_s29 = scalar_lea.vmem [#allocation2], %s580_s25  ;;  %p901_p11 = pnand %p633_p10, %p873_p3 }
  0x11   : > { %s146_s30 = sshll.u32 %s139_s29, 4  ;;  %s908_s4 = scalar_lea.sflag [#allocation3], %s135_s23  ;;  %s905_s30 = int_to_ptr.vmem [resolvable:$true] %s146_s30 }
  0x12   : > { %s736_s5 = scalar_lea.hbm %s897_s28, 4096  ;;  %p738_p0 = pneg %p901_p11 }
  0x13   : > { %p737_p13 = scmp.ne.s32.totalorder %s897_s28, %s736_s5  ;;  %s741_s8 = scalar_lea.hbm %s1014_s1, 8192 }
  0x14   : > { %p742_p3 = scmp.lt.u32.totalorder %s897_s28, %s1014_s1  ;;  %p743_p4 = scmp.lt.u32.totalorder %s741_s8, %s736_s5 }
  0x15   : > { %p739_p1 = pnand %p738_p0, %p737_p13  ;;  %p745_p6 = scmp.lt.u32.totalorder %s736_s5, %s897_s28 }
  0x16   : > { %p744_p5 = por %p743_p4, %p742_p3 }
  0x17   : > { %p740_p2 = pneg %p739_p1 }
  0x18   : > { %p746_p7 = por %p745_p6, %p744_p5 }
  0x1a   : > { %p747_p10 = pnand %p746_p7, %p740_p2 }
  0x1c   : > { %750 = shalt.err (!%p747_p10)
}
  0x1d   : > { %s751_s17 = scalar_lea.vmem %s905_s30, 4096  ;;  %s818_s18 = smov [#allocation2]  }
  0x1e   : > { %p752_p13 = scmp.ne.s32.totalorder %s905_s30, %s751_s17  ;;  %s756_s19 = sshll.u32 %s818_s18, 4  ;;  %s757_s19 = int_to_ptr.vmem [resolvable:$false] %s756_s19 }
  0x1f   : > { %s758_s23 = scalar_lea.vmem %s757_s19, 8192  ;;  %p759_p9 = scmp.lt.s32.totalorder %s905_s30, %s757_s19 }
  0x20   : > { %p754_p1 = pnand %p752_p13, %p738_p0  ;;  %p760_p3 = scmp.lt.s32.totalorder %s758_s23, %s751_s17 }
  0x22   : > { %p755_p12 = pneg %p754_p1  ;;  %p761_p4 = por %p760_p3, %p759_p9 }
  0x24   : > { %p762_p5 = pnand %p761_p4, %p755_p12 }
  0x26   : > { %765 = shalt.err (!%p762_p5)
}
  0x27   : > { %s819_s24 = smov 256   ;;  %s820_s25 = smov 128  }
  0x28   : > { %s821_s26 = smov 8   ;;  %p154_p0 = scmp.lt.s32.totalorder %s816_s14, 3 }
  0x29   : > { %632 = dma.hbm_to_vmem [thread:$0]  (!%p901_p11), %s897_s28, 4096, %s905_s30, %s908_s4, %s819_s24, %s820_s25, %s821_s26  }
  0x2a   : > { %p1020_p2 = scmp.ge.s32.totalorder %s816_s14, 1 }
  0x2c   : > { %p155_p6 = pnand %p1020_p2, %p154_p0 }
  0x2d   : > { %s940_s27 = sand.u32 (!%p155_p6), 1, %s800_s10  }
  0x2e   : > { %158 = sbr.rel (%p155_p6) target bundleno = 343 (0x157), region = 28  ;;  %s584_s29 = sshll.u32 (!%p155_p6), %s940_s27, 8 }
  0x2f   : > { %s161_s5 = scalar_lea.sflag (!%p155_p6), [#allocation3], %s940_s27  ;;  %s944_s6 = scalar_lea.vmem (!%p155_p6), [#allocation2], %s584_s29 }
  0x35   : > { %791 = dma.done.wait (%p880_p8), %s161_s5, 4096  }
  0x36   : > { %793 = vsyncadd (%p880_p8), %s161_s5, 4294963200  ;;  %v685_v0 = vld [vmem:[%s944_s6 + $0x4] ss:$8 sps:$4 sm:$0xff]   ;;  %v687_v1 = vld [vmem:[%s944_s6] ss:$8 sps:$4 sm:$0xff]   ;;  %s585_s4 = sshll.u32 %s940_s27, 5 }
  0x37   : > { %404 = vmatprep.subr.bf16.mxu0 %v685_v0  ;;  %v688_v2 = vld [vmem:[%s944_s6 + $0x14] ss:$8 sps:$4 sm:$0xff]   ;;  %v690_v3 = vld [vmem:[%s944_s6 + $0x10] ss:$8 sps:$4 sm:$0xff]   ;;  %v691_v4 = vld [vmem:[%s944_s6 + $0x24] ss:$8 sps:$4 sm:$0xff]  }
  0x38   : > { %405 = vmatpush1.bf16.msra.mxu0 %v687_v1  ;;  %v693_v5 = vld [vmem:[%s944_s6 + $0x20] ss:$8 sps:$4 sm:$0xff]   ;;  %v694_v6 = vld [vmem:[%s944_s6 + $0x34] ss:$8 sps:$4 sm:$0xff]   ;;  %v696_v7 = vld [vmem:[%s944_s6 + $0x30] ss:$8 sps:$4 sm:$0xff]  }
  0x39   : > { %406 = vmatprep.subr.bf16.mxu0 %v688_v2  ;;  %v697_v8 = vld [vmem:[%s944_s6 + $0x44] ss:$8 sps:$4 sm:$0xff]   ;;  %v699_v9 = vld [vmem:[%s944_s6 + $0x40] ss:$8 sps:$4 sm:$0xff]   ;;  %v700_v10 = vld [vmem:[%s944_s6 + $0x54] ss:$8 sps:$4 sm:$0xff]  }
  0x3a   : > { %v702_v11 = vld [vmem:[%s944_s6 + $0x50] ss:$8 sps:$4 sm:$0xff]   ;;  %v703_v12 = vld [vmem:[%s944_s6 + $0x64] ss:$8 sps:$4 sm:$0xff]   ;;  %v705_v14 = vld [vmem:[%s944_s6 + $0x60] ss:$8 sps:$4 sm:$0xff]  }
  0x3b   : > { %v735_v13 = vld [vmem:[%s1013_s0 + $0x4] ss:$8 sps:$4 sm:$0xff]   ;;  %v706_v15 = vld [vmem:[%s944_s6 + $0x74] ss:$8 sps:$4 sm:$0xff]   ;;  %v708_v16 = vld [vmem:[%s944_s6 + $0x70] ss:$8 sps:$4 sm:$0xff]  }
  0x3c   : > { %407 = vmatpush1.bf16.msra.mxu0 %v690_v3  ;;  %436 = vmatprep.mubr.bf16.mxu0 %v735_v13  ;;  %v709_v17 = vld [vmem:[%s944_s6 + $0x84] ss:$8 sps:$4 sm:$0xff]   ;;  %v711_v18 = vld [vmem:[%s944_s6 + $0x80] ss:$8 sps:$4 sm:$0xff]   ;;  %v712_v19 = vld [vmem:[%s944_s6 + $0x94] ss:$8 sps:$4 sm:$0xff]  }
  0x3d   : > { %408 = vmatprep.subr.bf16.mxu0 %v691_v4  ;;  %v714_v20 = vld [vmem:[%s944_s6 + $0x90] ss:$8 sps:$4 sm:$0xff]   ;;  %v715_v21 = vld [vmem:[%s944_s6 + $0xa4] ss:$8 sps:$4 sm:$0xff]   ;;  %v717_v22 = vld [vmem:[%s944_s6 + $0xa0] ss:$8 sps:$4 sm:$0xff]  }
  0x3e   : > { %v718_v23 = vld [vmem:[%s944_s6 + $0xb4] ss:$8 sps:$4 sm:$0xff]   ;;  %v720_v24 = vld [vmem:[%s944_s6 + $0xb0] ss:$8 sps:$4 sm:$0xff]   ;;  %v721_v25 = vld [vmem:[%s944_s6 + $0xc4] ss:$8 sps:$4 sm:$0xff]  }
  0x3f   : > { %v723_v26 = vld [vmem:[%s944_s6 + $0xc0] ss:$8 sps:$4 sm:$0xff]   ;;  %v724_v27 = vld [vmem:[%s944_s6 + $0xd4] ss:$8 sps:$4 sm:$0xff]   ;;  %v726_v28 = vld [vmem:[%s944_s6 + $0xd0] ss:$8 sps:$4 sm:$0xff]  }
  0x40   : > { %409 = vmatpush1.bf16.msra.mxu0 %v693_v5  ;;  %v727_v29 = vld [vmem:[%s944_s6 + $0xe4] ss:$8 sps:$4 sm:$0xff]   ;;  %v729_v30 = vld [vmem:[%s944_s6 + $0xe0] ss:$8 sps:$4 sm:$0xff]   ;;  %v730_v31 = vld [vmem:[%s944_s6 + $0xf4] ss:$8 sps:$4 sm:$0xff]  }
  0x41   : > { %410 = vmatprep.subr.bf16.mxu0 %v694_v6  ;;  %v732_v32 = vld [vmem:[%s944_s6 + $0xf0] ss:$8 sps:$4 sm:$0xff]   ;;  %v733_v33 = vld [vmem:[%s1013_s0] ss:$8 sps:$4 sm:$0xff]   ;;  %s189_s7 = scalar_lea.vmem [#allocation4], %s585_s4  ;;  %p1021_p8 = scmp.ne.s32.totalorder %s1018_s22, 0 }
  0x42   : > { %s626_s8 = sshll.u32 (%p1021_p8), %s808_s12, 4 }
  0x43   : > { %s463_s17 = scalar_lea.vmem (%p1021_p8), %s1015_s2, %s626_s8 }
  0x44   : > { %411 = vmatpush1.bf16.msra.mxu0 %v696_v7 }
  0x45   : > { %412 = vmatprep.subr.bf16.mxu0 %v697_v8 }
  0x48   : > { %413 = vmatpush1.bf16.msra.mxu0 %v699_v9 }
  0x49   : > { %414 = vmatprep.subr.bf16.mxu0 %v700_v10 }
  0x4c   : > { %415 = vmatpush1.bf16.msra.mxu0 %v702_v11 }
  0x4d   : > { %416 = vmatprep.subr.bf16.mxu0 %v703_v12 }
  0x50   : > { %417 = vmatpush1.bf16.msra.mxu0 %v705_v14 }
  0x51   : > { %418 = vmatprep.subr.bf16.mxu0 %v706_v15 }
  0x54   : > { %419 = vmatpush1.bf16.msra.mxu0 %v708_v16 }
  0x55   : > { %420 = vmatprep.subr.bf16.mxu0 %v709_v17 }
  0x58   : > { %421 = vmatpush1.bf16.msra.mxu0 %v711_v18 }
  0x59   : > { %422 = vmatprep.subr.bf16.mxu0 %v712_v19 }
  0x5c   : > { %423 = vmatpush1.bf16.msra.mxu0 %v714_v20 }
  0x5d   : > { %424 = vmatprep.subr.bf16.mxu0 %v715_v21 }
  0x60   : > { %425 = vmatpush1.bf16.msra.mxu0 %v717_v22 }
  0x61   : > { %426 = vmatprep.subr.bf16.mxu0 %v718_v23 }
  0x64   : > { %427 = vmatpush1.bf16.msra.mxu0 %v720_v24 }
  0x65   : > { %428 = vmatprep.subr.bf16.mxu0 %v721_v25 }
  0x68   : > { %429 = vmatpush1.bf16.msra.mxu0 %v723_v26 }
  0x69   : > { %430 = vmatprep.subr.bf16.mxu0 %v724_v27 }
  0x6c   : > { %431 = vmatpush1.bf16.msra.mxu0 %v726_v28 }
  0x6d   : > { %432 = vmatprep.subr.bf16.mxu0 %v727_v29 }
  0x70   : > { %433 = vmatpush1.bf16.msra.mxu0 %v729_v30 }
  0x71   : > { %434 = vmatprep.subr.bf16.mxu0 %v730_v31 }
  0x74   : > { %435 = vmatpush1.bf16.msra.mxu0 %v732_v32 }
  0x77   : > { %437 = vmatmul.mubr.bf16.vlgmr.msra.gmra.mrb[0].mxu0 %v733_v33 }
 0x148   : > { %457 = sbr.rel (!%p1021_p8) target bundleno = 343 (0x157), region = 36 }
 0x14a   : > { %v438_v34 = vpop.f32.mrb[0].mxu0 }
 0x14b   : > { %447 = vst [vmem:[%s189_s7] sm:$0xff] %v438_v34  ;;  %v440_v35 = vpop.f32.mrb[1].mxu0 }
 0x14c   : > { %448 = vst [vmem:[%s189_s7 + $0x8] sm:$0xff] %v440_v35  ;;  %v442_v36 = vpop.f32.mrb[2].mxu0 }
 0x14d   : > { %449 = vst [vmem:[%s189_s7 + $0x10] sm:$0xff] %v442_v36  ;;  %v444_v37 = vpop.f32.mrb[3].mxu0 }
 0x14e   : > { %450 = vst [vmem:[%s189_s7 + $0x18] sm:$0xff] %v444_v37 }
 0x152   : > { %v476_v38 = vld [vmem:[%s189_s7] sm:$0xff] }
 0x153   : > { %v478_v39 = vld [vmem:[%s189_s7 + $0x8] sm:$0xff]  ;;  %477 = vst [vmem:[%s463_s17] sm:$0xff] %v476_v38 }
 0x154   : > { %v480_v40 = vld [vmem:[%s189_s7 + $0x10] sm:$0xff]  ;;  %479 = vst [vmem:[%s463_s17 + $0x8] sm:$0xff] %v478_v39 }
 0x155   : > { %v482_v41 = vld [vmem:[%s189_s7 + $0x18] sm:$0xff]  ;;  %481 = vst [vmem:[%s463_s17 + $0x20] sm:$0xff] %v480_v40 }
 0x156   : > { %483 = vst [vmem:[%s463_s17 + $0x28] sm:$0xff] %v482_v41 }
 0x157 PF: > { %s15_s14 = sadd.s32 1, %s816_s14   ;;  %s1022_s9 = smov %s800_s10 }
 0x158   : > { %p12_p9 = scmp.ge.s32.totalorder %s15_s14, 4   ;;  %s1023_s10 = smov %s804_s11 }
 0x159   : > { %s1024_s11 = smov %s885_s21  ;;  %s1025_s12 = smov %s812_s13 }
 0x15a   : > { %s1026_s13 = smov %s1028_s16  ;;  %14 = sbr.rel (!%p12_p9) target bundleno = 4 (0x4), region = 94 }
 0x161   :  { %499 = vsyncpa [#allocation3], 1 }
 0x162   :  { %501 = vsyncpa [#allocation3 + $0x1], 1 }

</bundles_post_ra>
